<compile_context>
chip_gen: v7x
topology: tpu7x:2x2x1
jax: 0.10.0
libtpu: 0.0.40
codegen_flags: <defaults>
</compile_context>

<pallas_src>
import jax
import jax.numpy as jnp
from jax.experimental import pallas as pl
from jax.experimental.pallas import tpu as pltpu

_TILE_ROWS = 512          # (512, 128) f32 tile = 256 KiB
_LANES = 128
_MIN_PALLAS_ELEMS = 16 * 1024   # below this, a plain fused XLA op is faster


def _linreg_kernel(w_ref, b_ref, x_ref, o_ref):
    # w_ref / b_ref: (1,) scalars in SMEM (scalar prefetch).
    # x_ref / o_ref: (_TILE_ROWS, _LANES) f32 tiles in VMEM. Pure VPU FMA.
    o_ref[...] = x_ref[...] * w_ref[0] + b_ref[0]


def _linreg_pallas_2d(x2d: jnp.ndarray, w1: jnp.ndarray, b1: jnp.ndarray) -> jnp.ndarray:
    rows, _ = x2d.shape
    return pl.pallas_call(
        _linreg_kernel,
        out_shape=jax.ShapeDtypeStruct((rows, _LANES), jnp.float32),
        grid_spec=pltpu.PrefetchScalarGridSpec(
            num_scalar_prefetch=2,
            grid=(rows // _TILE_ROWS,),
            in_specs=[
                pl.BlockSpec((_TILE_ROWS, _LANES), lambda i, w, b: (i, 0)),
            ],
            out_specs=pl.BlockSpec((_TILE_ROWS, _LANES), lambda i, w, b: (i, 0)),
        ),
        compiler_params=pltpu.CompilerParams(
            dimension_semantics=("parallel",),
        ),
        # NOTE: input_output_aliases could alias x's buffer to the output for a
        # minor HBM-allocation win; omitted to keep x usable by callers.
    )(w1, b1, x2d)


def linear_regression_v2(x: jnp.ndarray, weight: jnp.ndarray, bias: jnp.ndarray) -> jnp.ndarray:
    """Forward of nn.Linear(1, 1): x of shape (..., 1) -> y of shape (..., 1)."""
    x = jnp.asarray(x, jnp.float32)
    orig_shape = x.shape
    w1 = jnp.asarray(weight, jnp.float32).reshape(1)
    b1 = jnp.asarray(bias, jnp.float32).reshape(1)

    total = x.size
    if total < _MIN_PALLAS_ELEMS:
        # Launch + per-grid-step overhead dwarfs 8-ish FMAs; plain XLA is faster.
        return x * w1[0] + b1[0]

    # Lane-dense slab: pad flat element count to a whole number of tiles, view
    # as (rows, 128), run the tiled kernel, then strip padding and reshape back.
    block = _TILE_ROWS * _LANES
    padded = ((total + block - 1) // block) * block
    x_flat = x.reshape(-1)
    if padded != total:
        x_flat = jnp.pad(x_flat, (0, padded - total))
    x2d = x_flat.reshape(padded // _LANES, _LANES)

    y2d = _linreg_pallas_2d(x2d, w1, b1)
    return y2d.reshape(-1)[:total].reshape(orig_shape)


if __name__ == "__main__":
    key = jax.random.PRNGKey(0)
    kx1, kx2, kw, kb = jax.random.split(key, 4)

    # nn.Linear(1, 1) parameters: weight (out, in) = (1, 1), bias (out,) = (1,)
    weight = jax.random.normal(kw, (1, 1), dtype=jnp.float32)
    bias = jax.random.normal(kb, (1,), dtype=jnp.float32)

    # 1) Pallas path: big enough to exercise the tiled, lane-dense kernel and
    #    the padding logic (N is intentionally not a tile multiple).
    n_big = 2 * _TILE_ROWS * _LANES + 100   # -> 3 grid steps after padding
    x_big = jax.random.normal(kx1, (n_big, 1), dtype=jnp.float32)
    y_big = jax.block_until_ready(linear_regression_v2(x_big, weight, bias))
    ref_big = x_big @ weight.T + bias
    assert y_big.shape == (n_big, 1)
    assert jnp.allclose(y_big, ref_big, atol=1e-6), "pallas path mismatch vs reference"

    # 2) Tiny-input fallback path (plain XLA), same module semantics at N=8.
    x_small = jax.random.normal(kx2, (8, 1), dtype=jnp.float32)
    y_small = jax.block_until_ready(linear_regression_v2(x_small, weight, bias))
    ref_small = x_small @ weight.T + bias
    assert y_small.shape == (8, 1)
    assert jnp.allclose(y_small, ref_small, atol=1e-6), "fallback path mismatch vs reference"

    print("KERNEL_OK")
</pallas_src>

<mosaic_0001>
module attributes {stable_mosaic.version = 11 : i64} {
  func.func @_linreg_kernel(%arg0: i32, %arg1: memref<1xf32, #tpu.memory_space<smem>>, %arg2: memref<1xf32, #tpu.memory_space<smem>>, %arg3: memref<512x128xf32, #tpu.memory_space<vmem>>, %arg4: memref<512x128xf32, #tpu.memory_space<vmem>>) attributes {dimension_semantics = [#tpu.dimension_semantics<parallel>], iteration_bounds = array<i64: 3>, scalar_prefetch = 2 : i64, scratch_operands = 0 : i64, tpu.core_type = #tpu.core_type<tc>, window_params = [{transform_indices = @transform_0, window_bounds = array<i64: 512, 128>}, {transform_indices = @transform_1, window_bounds = array<i64: 512, 128>}]} {
    %c0 = arith.constant 0 : index
    %c0_0 = arith.constant 0 : index
    %0 = vector.load %arg3[%c0, %c0_0] : memref<512x128xf32, #tpu.memory_space<vmem>>, vector<512x128xf32>
    %c0_1 = arith.constant 0 : index
    %1 = memref.load %arg1[%c0_1] : memref<1xf32, #tpu.memory_space<smem>>
    %2 = vector.broadcast %1 : f32 to vector<512x128xf32>
    %3 = arith.mulf %0, %2 : vector<512x128xf32>
    %c0_2 = arith.constant 0 : index
    %4 = memref.load %arg2[%c0_2] : memref<1xf32, #tpu.memory_space<smem>>
    %5 = vector.broadcast %4 : f32 to vector<512x128xf32>
    %6 = arith.addf %3, %5 : vector<512x128xf32>
    %c0_3 = arith.constant 0 : index
    %c0_4 = arith.constant 0 : index
    %7 = vector.load %arg4[%c0_3, %c0_4] : memref<512x128xf32, #tpu.memory_space<vmem>>, vector<512x128xf32>
    tpu.vector_store %arg4[%c0_3, %c0_4], %6 {strides = array<i32>} : memref<512x128xf32, #tpu.memory_space<vmem>>, vector<512x128xf32>,
    return
  }
  func.func @transform_0(%arg0: i32, %arg1: memref<1xf32, #tpu.memory_space<smem>>, %arg2: memref<1xf32, #tpu.memory_space<smem>>) -> (i32, i32) {
    %c0_i32 = arith.constant 0 : i32
    %c0_i32_0 = arith.constant 0 : i32
    return %arg0, %c0_i32 : i32, i32
  }
  func.func @transform_1(%arg0: i32, %arg1: memref<1xf32, #tpu.memory_space<smem>>, %arg2: memref<1xf32, #tpu.memory_space<smem>>) -> (i32, i32) {
    %c0_i32 = arith.constant 0 : i32
    %c0_i32_0 = arith.constant 0 : i32
    return %arg0, %c0_i32 : i32, i32
  }
}

</mosaic_0001>

<bundles_post_ra>
// kernel: tpu_custom_call.1
= control target key start
LH: loop header
LB: loop body
LE: loop exit
PB: predicated region body
PF: predicated region fallthrough
CT: control target
= control target key end

     0   :  { %s1113_s0 = inlined_call_operand.<no memory space> [shape: f32[1], index: 0, kind: input, shape index: {}]   ;;  %s1114_s1 = inlined_call_operand.<no memory space> [shape: f32[1], index: 1, kind: input, shape index: {}]   ;;  %s1115_s2 = inlined_call_operand.hbm [shape: f32[1536,128], index: 2, kind: input, shape index: {}]   ;;  %s1116_s3 = inlined_call_operand.hbm [shape: f32[1536,128], index: 3, kind: output, shape index: {}]  }
   0x1   :  { %8 = sst [smem:[#allocation3]] %s1113_s0 }
   0x2   :  { %9 = sst [smem:[#allocation4]] %s1114_s1 }
   0x3   :  { %10 = vsyncpa [#allocation6], 0 }
   0x4   :  { %12 = vsyncpa [#allocation6 + $0x1], 0 }
   0x5   :  { %13 = vsyncpa [#allocation7], 0 }
   0x6   :  { %15 = vsyncpa [#allocation7 + $0x1], 0  ;;  %s684_s16 = smov 0   ;;  %s686_s17 = smov 0  }
   0x7   :  { %s688_s18 = smov 0   ;;  %s690_s19 = smov 0  }
   0x8 LB: > { %s705_s0 = sadd.s32 4294967295, %s650_s19   ;;  %s488_s1 = sadd.s32 4294967294, %s650_s19   ;;  %s650_s19 = sphi %s690_s19, %s1128_s19   ;;  %s646_s18 = sphi %s688_s18, %s1127_s18   ;;  %s642_s17 = sphi %s686_s17, %s1126_s17   ;;  %s638_s16 = sphi %s684_s16, %s1125_s16  }
   0x9   : > { %s709_s20 = sadd.s32 1, %s650_s19   ;;  %s28_s21 = sadd.s32 1, %s646_s18 }
   0xa   : > { %s25_s22 = ssub.s32 %s650_s19, %s709_s20  ;;  %p35_p0 = scmp.ne.s32.totalorder %s646_s18, %s642_s17 }
   0xb   : > { %p26_p1 = scmp.eq.s32.totalorder %s25_s22, 0  ;;  %p36_p2 = scmp.eq.s32.totalorder %s650_s19, 0 }
   0xc   : > { %p41_p3 = scmp.ne.s32.totalorder %s642_s17, %s638_s16  ;;  %p42_p4 = scmp.eq.s32.totalorder %s705_s0, 0 }
   0xd   : > { %s721_s23 = scalar_select %p26_p1, %s646_s18, %s28_s21  }
   0xe   : > { %p723_p5 = por %p36_p2, %p35_p0  ;;  %p727_p6 = por %p42_p4, %p41_p3 }
   0xf   : > { %p65_p7 = scmp.eq.s32.totalorder %s705_s0, 2  ;;  %p71_p8 = scmp.eq.s32.totalorder %s488_s1, 2 }
  0x10   : > { %p516_p9 = scmp.lt.s32.totalorder %s650_s19, 3  ;;  %s91_s28 = sand.u32 1, %s646_s18  }
  0x11   : > { %p733_p10 = por %p65_p7, %p35_p0  ;;  %p737_p11 = por %p71_p8, %p41_p3 }
  0x12   : > { %s502_s29 = sshll.u32 %s650_s19, 13  ;;  %s491_s30 = sshll.u32 %s91_s28, 9 }
  0x13   : > { %s1120_s26 = scalar_select %p733_p10, 1, 0 }
  0x14   : > { %s1121_s27 = scalar_select %p737_p11, 1, 0 }
  0x15   : > { %s746_s6 = scalar_lea.hbm %s1115_s2, %s502_s29  ;;  %s95_s7 = scalar_lea.vmem [#allocation5], %s491_s30 }
  0x16   : > { %s102_s8 = sshll.u32 %s95_s7, 4  ;;  %p750_p12 = pnand %p516_p9, %p723_p5  ;;  %s754_s8 = int_to_ptr.vmem [resolvable:$true] %s102_s8 }
  0x17   : > { %s756_s10 = scalar_lea.sflag [#allocation6], %s91_s28  ;;  %s554_s11 = scalar_lea.hbm %s746_s6, 8192 }
  0x18   : > { %p555_p13 = scmp.ne.s32.totalorder %s746_s6, %s554_s11  ;;  %p556_p0 = pneg %p750_p12 }
  0x19   : > { %s559_s14 = scalar_lea.hbm %s1115_s2, 24576  ;;  %p560_p3 = scmp.lt.u32.totalorder %s746_s6, %s1115_s2 }
  0x1a   : > { %p557_p1 = pnand %p556_p0, %p555_p13  ;;  %p561_p4 = scmp.lt.u32.totalorder %s559_s14, %s554_s11 }
  0x1b   : > { %p563_p7 = scmp.lt.u32.totalorder %s554_s11, %s746_s6 }
  0x1c   : > { %p558_p2 = pneg %p557_p1  ;;  %p562_p5 = por %p561_p4, %p560_p3 }
  0x1e   : > { %p564_p8 = por %p563_p7, %p562_p5 }
  0x20   : > { %p565_p9 = pnand %p564_p8, %p558_p2 }
  0x22   : > { %568 = shalt.err (!%p565_p9)
}
  0x23   : > { %s569_s21 = scalar_lea.vmem %s754_s8, 8192  ;;  %s652_s22 = smov [#allocation5]  }
  0x24   : > { %p570_p13 = scmp.ne.s32.totalorder %s754_s8, %s569_s21  ;;  %s574_s24 = sshll.u32 %s652_s22, 4  ;;  %s575_s24 = int_to_ptr.vmem [resolvable:$false] %s574_s24 }
  0x25   : > { %s576_s28 = scalar_lea.vmem %s575_s24, 16384  ;;  %p577_p10 = scmp.lt.s32.totalorder %s754_s8, %s575_s24 }
  0x26   : > { %p572_p1 = pnand %p570_p13, %p556_p0  ;;  %p578_p3 = scmp.lt.s32.totalorder %s576_s28, %s569_s21 }
  0x28   : > { %p573_p11 = pneg %p572_p1  ;;  %p579_p4 = por %p578_p3, %p577_p10 }
  0x2a   : > { %p580_p5 = pnand %p579_p4, %p573_p11 }
  0x2c   : > { %583 = shalt.err (!%p580_p5)
}
  0x2d   : > { %s653_s29 = smov 128   ;;  %s654_s30 = smov 8  }
  0x2e   : > { %511 = dma.hbm_to_vmem [thread:$0]  (!%p750_p12), %s746_s6, 8192, %s754_s8, %s756_s10, %s653_s29, %s653_s29, %s654_s30  }
  0x2f   : > { %p494_p0 = scmp.ge.s32.totalorder %s650_s19, 1  ;;  %p110_p2 = scmp.lt.s32.totalorder %s650_s19, 4 }
  0x31   : > { %p111_p7 = pnand %p494_p0, %p110_p2 }
  0x32   : > { %s787_s4 = sand.u32 (!%p111_p7), 1, %s642_s17  }
  0x33   : > { %114 = sbr.rel (%p111_p7) target bundleno = 122 (0x7a), region = 24  ;;  %s495_s5 = sshll.u32 (!%p111_p7), %s787_s4, 9 }
  0x34   : > { %s117_s7 = scalar_lea.sflag (!%p111_p7), [#allocation6], %s787_s4  ;;  %s793_s11 = scalar_lea.vmem (!%p111_p7), [#allocation5], %s495_s5 }
  0x3a   : > { %629 = dma.done.wait (%p727_p6), %s117_s7, 8192  }
  0x3b   : > { %631 = vsyncadd (%p727_p6), %s117_s7, 4294959104  ;;  %s205_s6 = sld [smem:[#allocation3]]  ;;  %v141_v0 = vld [vmem:[%s793_s11] sm:$0xff]  ;;  %v142_v3 = vld [vmem:[%s793_s11 + $0x8] sm:$0xff]  ;;  %s832_s25 = scalar_lea.vmem [#allocation8], %s495_s5 }
  0x3c   : > { %s271_s8 = sld [smem:[#allocation4]]  ;;  %v143_v6 = vld [vmem:[%s793_s11 + $0x10] sm:$0xff]  ;;  %v144_v7 = vld [vmem:[%s793_s11 + $0x18] sm:$0xff]  ;;  %v145_v8 = vld [vmem:[%s793_s11 + $0x20] sm:$0xff]  ;;  %s503_s9 = sshll.u32 %s705_s0, 13 }
  0x3d   : > { %v146_v12 = vld [vmem:[%s793_s11 + $0x28] sm:$0xff]  ;;  %v147_v13 = vld [vmem:[%s793_s11 + $0x30] sm:$0xff]  ;;  %v148_v14 = vld [vmem:[%s793_s11 + $0x38] sm:$0xff]  ;;  %s415_s10 = sshll.u32 %s832_s25, 4  ;;  %s1061_s13 = scalar_lea.hbm %s1116_s3, %s503_s9  ;;  %s1063_s10 = int_to_ptr.vmem [resolvable:$true] %s415_s10 }
  0x3e   : > { %v149_v19 = vld [vmem:[%s793_s11 + $0x40] sm:$0xff]  ;;  %v150_v20 = vld [vmem:[%s793_s11 + $0x48] sm:$0xff]  ;;  %v151_v21 = vld [vmem:[%s793_s11 + $0x50] sm:$0xff]  ;;  %s402_s14 = scalar_lea.sflag [#allocation7], %s787_s4  ;;  %s584_s15 = scalar_lea.vmem %s1063_s10, 8192 }
  0x3f   : > { %v152_v26 = vld [vmem:[%s793_s11 + $0x58] sm:$0xff]  ;;  %v153_v27 = vld [vmem:[%s793_s11 + $0x60] sm:$0xff]  ;;  %v154_v28 = vld [vmem:[%s793_s11 + $0x68] sm:$0xff]  ;;  %p585_p6 = scmp.ne.s32.totalorder %s1063_s10, %s584_s15  ;;  %p1123_p10 = scmp.ne.s32.totalorder %s1120_s26, 0 }
  0x40   : > { %v155_v33 = vld [vmem:[%s793_s11 + $0x70] sm:$0xff]  ;;  %v156_v34 = vld [vmem:[%s793_s11 + $0x78] sm:$0xff]  ;;  %v157_v39 = vld [vmem:[%s793_s11 + $0x80] sm:$0xff]  ;;  %s655_s1 = smov [#allocation8]  }
  0x41   : > { %v800_v1 = vstv %s205_s6  ;;  %v158_v40 = vld [vmem:[%s793_s11 + $0x88] sm:$0xff]  ;;  %v159_v45 = vld [vmem:[%s793_s11 + $0x90] sm:$0xff]  ;;  %v160_v46 = vld [vmem:[%s793_s11 + $0x98] sm:$0xff]  ;;  %p586_p11 = pnand %p585_p6, %p1123_p10  ;;  %s588_s21 = sshll.u32 %s655_s1, 4  ;;  %s589_s21 = int_to_ptr.vmem [resolvable:$false] %s588_s21 }
  0x42   : > { %v802_v2 = vstv %s271_s8  ;;  %v207_v4 = vmul.f32 %v800_v1, %v141_v0  ;;  %v208_v5 = vmul.f32 %v800_v1, %v142_v3  ;;  %v209_v9 = vmul.f32 %v800_v1, %v143_v6  ;;  %v161_v47 = vld [vmem:[%s793_s11 + $0xa0] sm:$0xff]  ;;  %v162_v52 = vld [vmem:[%s793_s11 + $0xa8] sm:$0xff]  ;;  %v163_v53 = vld [vmem:[%s793_s11 + $0xb0] sm:$0xff]  ;;  %s590_s22 = scalar_lea.vmem %s589_s21, 16384  ;;  %p591_p8 = scmp.lt.s32.totalorder %s1063_s10, %s589_s21 }
  0x43   : > { %v210_v10 = vmul.f32 %v800_v1, %v144_v7  ;;  %v211_v11 = vmul.f32 %v800_v1, %v145_v8  ;;  %v212_v17 = vmul.f32 %v800_v1, %v146_v12  ;;  %v213_v18 = vmul.f32 %v800_v1, %v147_v13  ;;  %v164_v58 = vld [vmem:[%s793_s11 + $0xb8] sm:$0xff]  ;;  %v165_v63 = vld [vmem:[%s793_s11 + $0xc0] sm:$0xff]  ;;  %v166_v0 = vld [vmem:[%s793_s11 + $0xc8] sm:$0xff]  ;;  %p587_p12 = pneg %p586_p11  ;;  %p592_p9 = scmp.lt.s32.totalorder %s590_s22, %s584_s15 }
  0x44   : > { %v273_v15 = vadd.f32 %v802_v2, %v207_v4  ;;  %v274_v16 = vadd.f32 %v802_v2, %v208_v5  ;;  %v275_v22 = vadd.f32 %v802_v2, %v209_v9  ;;  %v214_v25 = vmul.f32 %v800_v1, %v148_v14  ;;  %v167_v7 = vld [vmem:[%s793_s11 + $0xd0] sm:$0xff]  ;;  %v168_v8 = vld [vmem:[%s793_s11 + $0xd8] sm:$0xff]  ;;  %v169_v9 = vld [vmem:[%s793_s11 + $0xe0] sm:$0xff] }
  0x45   : > { %v276_v23 = vadd.f32 %v802_v2, %v210_v10  ;;  %v277_v24 = vadd.f32 %v802_v2, %v211_v11  ;;  %v278_v29 = vadd.f32 %v802_v2, %v212_v17  ;;  %v279_v30 = vadd.f32 %v802_v2, %v213_v18  ;;  %v170_v14 = vld [vmem:[%s793_s11 + $0xe8] sm:$0xff]  ;;  %p593_p13 = por %p592_p9, %p591_p8 }
  0x46   : > { %337 = vst [vmem:[%s832_s25] sm:$0xff] %v273_v15  ;;  %338 = vst [vmem:[%s832_s25 + $0x8] sm:$0xff] %v274_v16  ;;  %v215_v31 = vmul.f32 %v800_v1, %v149_v19  ;;  %v216_v32 = vmul.f32 %v800_v1, %v150_v20  ;;  %v280_v35 = vadd.f32 %v802_v2, %v214_v25  ;;  %v171_v15 = vld [vmem:[%s793_s11 + $0xf0] sm:$0xff]  ;;  %v172_v20 = vld [vmem:[%s793_s11 + $0xf8] sm:$0xff] }
  0x47   : > { %339 = vst [vmem:[%s832_s25 + $0x10] sm:$0xff] %v275_v22  ;;  %340 = vst [vmem:[%s832_s25 + $0x18] sm:$0xff] %v276_v23  ;;  %v217_v36 = vmul.f32 %v800_v1, %v151_v21  ;;  %v218_v37 = vmul.f32 %v800_v1, %v152_v26  ;;  %v219_v38 = vmul.f32 %v800_v1, %v153_v27  ;;  %v173_v25 = vld [vmem:[%s793_s11 + $0x100] sm:$0xff]  ;;  %v174_v26 = vld [vmem:[%s793_s11 + $0x108] sm:$0xff]  ;;  %p594_p1 = pnand %p593_p13, %p587_p12 }
  0x48   : > { %341 = vst [vmem:[%s832_s25 + $0x20] sm:$0xff] %v277_v24  ;;  %342 = vst [vmem:[%s832_s25 + $0x28] sm:$0xff] %v278_v29  ;;  %v281_v41 = vadd.f32 %v802_v2, %v215_v31  ;;  %v282_v42 = vadd.f32 %v802_v2, %v216_v32  ;;  %v220_v43 = vmul.f32 %v800_v1, %v154_v28  ;;  %v175_v31 = vld [vmem:[%s793_s11 + $0x110] sm:$0xff]  ;;  %v176_v32 = vld [vmem:[%s793_s11 + $0x118] sm:$0xff] }
  0x49   : > { %343 = vst [vmem:[%s832_s25 + $0x30] sm:$0xff] %v279_v30  ;;  %v221_v44 = vmul.f32 %v800_v1, %v155_v33  ;;  %344 = vst [vmem:[%s832_s25 + $0x38] sm:$0xff] %v280_v35  ;;  %v283_v48 = vadd.f32 %v802_v2, %v217_v36  ;;  %v284_v49 = vadd.f32 %v802_v2, %v218_v37  ;;  %v177_v33 = vld [vmem:[%s793_s11 + $0x120] sm:$0xff] }
  0x4a   : > { %v285_v50 = vadd.f32 %v802_v2, %v219_v38  ;;  %v222_v51 = vmul.f32 %v800_v1, %v156_v34  ;;  %345 = vst [vmem:[%s832_s25 + $0x40] sm:$0xff] %v281_v41  ;;  %346 = vst [vmem:[%s832_s25 + $0x48] sm:$0xff] %v282_v42  ;;  %v286_v54 = vadd.f32 %v802_v2, %v220_v43  ;;  %v178_v38 = vld [vmem:[%s793_s11 + $0x128] sm:$0xff] }
  0x4b   : > { %v287_v55 = vadd.f32 %v802_v2, %v221_v44  ;;  %v223_v56 = vmul.f32 %v800_v1, %v157_v39  ;;  %v224_v57 = vmul.f32 %v800_v1, %v158_v40  ;;  %347 = vst [vmem:[%s832_s25 + $0x50] sm:$0xff] %v283_v48  ;;  %348 = vst [vmem:[%s832_s25 + $0x58] sm:$0xff] %v284_v49  ;;  %v179_v39 = vld [vmem:[%s793_s11 + $0x130] sm:$0xff]  ;;  %v180_v44 = vld [vmem:[%s793_s11 + $0x138] sm:$0xff] }
  0x4c   : > { %349 = vst [vmem:[%s832_s25 + $0x60] sm:$0xff] %v285_v50  ;;  %v288_v59 = vadd.f32 %v802_v2, %v222_v51  ;;  %v225_v60 = vmul.f32 %v800_v1, %v159_v45  ;;  %v226_v61 = vmul.f32 %v800_v1, %v160_v46  ;;  %v227_v62 = vmul.f32 %v800_v1, %v161_v47  ;;  %v181_v49 = vld [vmem:[%s793_s11 + $0x140] sm:$0xff]  ;;  %v182_v50 = vld [vmem:[%s793_s11 + $0x148] sm:$0xff] }
  0x4d   : > { %350 = vst [vmem:[%s832_s25 + $0x68] sm:$0xff] %v286_v54  ;;  %351 = vst [vmem:[%s832_s25 + $0x70] sm:$0xff] %v287_v55  ;;  %v289_v3 = vadd.f32 %v802_v2, %v223_v56  ;;  %v290_v4 = vadd.f32 %v802_v2, %v224_v57  ;;  %v228_v5 = vmul.f32 %v800_v1, %v162_v52  ;;  %v183_v55 = vld [vmem:[%s793_s11 + $0x150] sm:$0xff]  ;;  %v184_v56 = vld [vmem:[%s793_s11 + $0x158] sm:$0xff] }
  0x4e   : > { %v229_v6 = vmul.f32 %v800_v1, %v163_v53  ;;  %352 = vst [vmem:[%s832_s25 + $0x78] sm:$0xff] %v288_v59  ;;  %v291_v10 = vadd.f32 %v802_v2, %v225_v60  ;;  %v292_v11 = vadd.f32 %v802_v2, %v226_v61  ;;  %v293_v12 = vadd.f32 %v802_v2, %v227_v62  ;;  %v185_v57 = vld [vmem:[%s793_s11 + $0x160] sm:$0xff]  ;;  %v186_v62 = vld [vmem:[%s793_s11 + $0x168] sm:$0xff] }
  0x4f   : > { %v230_v13 = vmul.f32 %v800_v1, %v164_v58  ;;  %353 = vst [vmem:[%s832_s25 + $0x80] sm:$0xff] %v289_v3  ;;  %354 = vst [vmem:[%s832_s25 + $0x88] sm:$0xff] %v290_v4  ;;  %v294_v16 = vadd.f32 %v802_v2, %v228_v5  ;;  %v231_v18 = vmul.f32 %v800_v1, %v165_v63  ;;  %v187_v63 = vld [vmem:[%s793_s11 + $0x170] sm:$0xff] }
  0x50   : > { %v295_v17 = vadd.f32 %v802_v2, %v229_v6  ;;  %v232_v19 = vmul.f32 %v800_v1, %v166_v0  ;;  %355 = vst [vmem:[%s832_s25 + $0x90] sm:$0xff] %v291_v10  ;;  %356 = vst [vmem:[%s832_s25 + $0x98] sm:$0xff] %v292_v11  ;;  %v233_v22 = vmul.f32 %v800_v1, %v167_v7  ;;  %v188_v6 = vld [vmem:[%s793_s11 + $0x178] sm:$0xff]  ;;  %v189_v11 = vld [vmem:[%s793_s11 + $0x180] sm:$0xff] }
  0x51   : > { %357 = vst [vmem:[%s832_s25 + $0xa0] sm:$0xff] %v293_v12  ;;  %v296_v21 = vadd.f32 %v802_v2, %v230_v13  ;;  %v234_v23 = vmul.f32 %v800_v1, %v168_v8  ;;  %v235_v24 = vmul.f32 %v800_v1, %v169_v9  ;;  %358 = vst [vmem:[%s832_s25 + $0xa8] sm:$0xff] %v294_v16  ;;  %v190_v12 = vld [vmem:[%s793_s11 + $0x188] sm:$0xff] }
  0x52   : > { %359 = vst [vmem:[%s832_s25 + $0xb0] sm:$0xff] %v295_v17  ;;  %v297_v27 = vadd.f32 %v802_v2, %v231_v18  ;;  %v298_v28 = vadd.f32 %v802_v2, %v232_v19  ;;  %v236_v29 = vmul.f32 %v800_v1, %v170_v14  ;;  %v237_v30 = vmul.f32 %v800_v1, %v171_v15  ;;  %v191_v17 = vld [vmem:[%s793_s11 + $0x190] sm:$0xff]  ;;  %v192_v18 = vld [vmem:[%s793_s11 + $0x198] sm:$0xff]  ;;  %v193_v19 = vld [vmem:[%s793_s11 + $0x1a0] sm:$0xff] }
  0x53   : > { %360 = vst [vmem:[%s832_s25 + $0xb8] sm:$0xff] %v296_v21  ;;  %v299_v34 = vadd.f32 %v802_v2, %v233_v22  ;;  %v300_v35 = vadd.f32 %v802_v2, %v234_v23  ;;  %v301_v36 = vadd.f32 %v802_v2, %v235_v24  ;;  %v238_v37 = vmul.f32 %v800_v1, %v172_v20  ;;  %v194_v24 = vld [vmem:[%s793_s11 + $0x1a8] sm:$0xff] }
  0x54   : > { %361 = vst [vmem:[%s832_s25 + $0xc0] sm:$0xff] %v297_v27  ;;  %362 = vst [vmem:[%s832_s25 + $0xc8] sm:$0xff] %v298_v28  ;;  %v302_v40 = vadd.f32 %v802_v2, %v236_v29  ;;  %v303_v41 = vadd.f32 %v802_v2, %v237_v30  ;;  %v239_v42 = vmul.f32 %v800_v1, %v173_v25  ;;  %v195_v25 = vld [vmem:[%s793_s11 + $0x1b0] sm:$0xff]  ;;  %v196_v30 = vld [vmem:[%s793_s11 + $0x1b8] sm:$0xff] }
  0x55   : > { %v240_v43 = vmul.f32 %v800_v1, %v174_v26  ;;  %363 = vst [vmem:[%s832_s25 + $0xd0] sm:$0xff] %v299_v34  ;;  %364 = vst [vmem:[%s832_s25 + $0xd8] sm:$0xff] %v300_v35  ;;  %v304_v45 = vadd.f32 %v802_v2, %v238_v37  ;;  %v241_v46 = vmul.f32 %v800_v1, %v175_v31  ;;  %v197_v35 = vld [vmem:[%s793_s11 + $0x1c0] sm:$0xff] }
  0x56   : > { %365 = vst [vmem:[%s832_s25 + $0xe0] sm:$0xff] %v301_v36  ;;  %v242_v47 = vmul.f32 %v800_v1, %v176_v32  ;;  %v243_v48 = vmul.f32 %v800_v1, %v177_v33  ;;  %366 = vst [vmem:[%s832_s25 + $0xe8] sm:$0xff] %v302_v40  ;;  %v305_v51 = vadd.f32 %v802_v2, %v239_v42  ;;  %v198_v36 = vld [vmem:[%s793_s11 + $0x1c8] sm:$0xff]  ;;  %v200_v42 = vld [vmem:[%s793_s11 + $0x1d8] sm:$0xff] }
  0x57   : > { %367 = vst [vmem:[%s832_s25 + $0xf0] sm:$0xff] %v303_v41  ;;  %v306_v52 = vadd.f32 %v802_v2, %v240_v43  ;;  %v244_v53 = vmul.f32 %v800_v1, %v178_v38  ;;  %v245_v54 = vmul.f32 %v800_v1, %v179_v39  ;;  %368 = vst [vmem:[%s832_s25 + $0xf8] sm:$0xff] %v304_v45  ;;  %v199_v41 = vld [vmem:[%s793_s11 + $0x1d0] sm:$0xff]  ;;  %v201_v43 = vld [vmem:[%s793_s11 + $0x1e0] sm:$0xff] }
  0x58   : > { %v307_v58 = vadd.f32 %v802_v2, %v241_v46  ;;  %v308_v59 = vadd.f32 %v802_v2, %v242_v47  ;;  %v309_v60 = vadd.f32 %v802_v2, %v243_v48  ;;  %v246_v61 = vmul.f32 %v800_v1, %v180_v44  ;;  %369 = vst [vmem:[%s832_s25 + $0x100] sm:$0xff] %v305_v51  ;;  %v202_v48 = vld [vmem:[%s793_s11 + $0x1e8] sm:$0xff] }
  0x59   : > { %370 = vst [vmem:[%s832_s25 + $0x108] sm:$0xff] %v306_v52  ;;  %v310_v0 = vadd.f32 %v802_v2, %v244_v53  ;;  %v311_v3 = vadd.f32 %v802_v2, %v245_v54  ;;  %v247_v4 = vmul.f32 %v800_v1, %v181_v49  ;;  %v248_v5 = vmul.f32 %v800_v1, %v182_v50  ;;  %v203_v49 = vld [vmem:[%s793_s11 + $0x1f0] sm:$0xff]  ;;  %v204_v54 = vld [vmem:[%s793_s11 + $0x1f8] sm:$0xff] }
  0x5a   : > { %371 = vst [vmem:[%s832_s25 + $0x110] sm:$0xff] %v307_v58  ;;  %372 = vst [vmem:[%s832_s25 + $0x118] sm:$0xff] %v308_v59  ;;  %v312_v7 = vadd.f32 %v802_v2, %v246_v61  ;;  %v249_v8 = vmul.f32 %v800_v1, %v183_v55  ;;  %v250_v9 = vmul.f32 %v800_v1, %v184_v56 }
  0x5b   : > { %373 = vst [vmem:[%s832_s25 + $0x120] sm:$0xff] %v309_v60  ;;  %v251_v10 = vmul.f32 %v800_v1, %v185_v57  ;;  %374 = vst [vmem:[%s832_s25 + $0x128] sm:$0xff] %v310_v0  ;;  %v313_v13 = vadd.f32 %v802_v2, %v247_v4  ;;  %v314_v14 = vadd.f32 %v802_v2, %v248_v5 }
  0x5c   : > { %375 = vst [vmem:[%s832_s25 + $0x130] sm:$0xff] %v311_v3  ;;  %v252_v15 = vmul.f32 %v800_v1, %v186_v62  ;;  %v253_v16 = vmul.f32 %v800_v1, %v187_v63  ;;  %376 = vst [vmem:[%s832_s25 + $0x138] sm:$0xff] %v312_v7  ;;  %v315_v20 = vadd.f32 %v802_v2, %v249_v8 }
  0x5d   : > { %v316_v21 = vadd.f32 %v802_v2, %v250_v9  ;;  %v317_v22 = vadd.f32 %v802_v2, %v251_v10  ;;  %v254_v23 = vmul.f32 %v800_v1, %v188_v6  ;;  %377 = vst [vmem:[%s832_s25 + $0x140] sm:$0xff] %v313_v13  ;;  %378 = vst [vmem:[%s832_s25 + $0x148] sm:$0xff] %v314_v14 }
  0x5e   : > { %v318_v26 = vadd.f32 %v802_v2, %v252_v15  ;;  %v319_v27 = vadd.f32 %v802_v2, %v253_v16  ;;  %v255_v28 = vmul.f32 %v800_v1, %v189_v11  ;;  %v256_v29 = vmul.f32 %v800_v1, %v190_v12  ;;  %379 = vst [vmem:[%s832_s25 + $0x150] sm:$0xff] %v315_v20 }
  0x5f   : > { %380 = vst [vmem:[%s832_s25 + $0x158] sm:$0xff] %v316_v21  ;;  %381 = vst [vmem:[%s832_s25 + $0x160] sm:$0xff] %v317_v22  ;;  %v320_v31 = vadd.f32 %v802_v2, %v254_v23  ;;  %v257_v32 = vmul.f32 %v800_v1, %v191_v17  ;;  %v258_v33 = vmul.f32 %v800_v1, %v192_v18 }
  0x60   : > { %v259_v34 = vmul.f32 %v800_v1, %v193_v19  ;;  %382 = vst [vmem:[%s832_s25 + $0x168] sm:$0xff] %v318_v26  ;;  %383 = vst [vmem:[%s832_s25 + $0x170] sm:$0xff] %v319_v27  ;;  %v321_v37 = vadd.f32 %v802_v2, %v255_v28  ;;  %v322_v38 = vadd.f32 %v802_v2, %v256_v29 }
  0x61   : > { %v260_v39 = vmul.f32 %v800_v1, %v194_v24  ;;  %v261_v40 = vmul.f32 %v800_v1, %v195_v25  ;;  %384 = vst [vmem:[%s832_s25 + $0x178] sm:$0xff] %v320_v31  ;;  %v323_v44 = vadd.f32 %v802_v2, %v257_v32  ;;  %v324_v45 = vadd.f32 %v802_v2, %v258_v33 }
  0x62   : > { %v325_v46 = vadd.f32 %v802_v2, %v259_v34  ;;  %v262_v47 = vmul.f32 %v800_v1, %v196_v30  ;;  %385 = vst [vmem:[%s832_s25 + $0x180] sm:$0xff] %v321_v37  ;;  %386 = vst [vmem:[%s832_s25 + $0x188] sm:$0xff] %v322_v38  ;;  %v263_v52 = vmul.f32 %v800_v1, %v197_v35 }
  0x63   : > { %v326_v50 = vadd.f32 %v802_v2, %v260_v39  ;;  %v327_v51 = vadd.f32 %v802_v2, %v261_v40  ;;  %v264_v53 = vmul.f32 %v800_v1, %v198_v36  ;;  %387 = vst [vmem:[%s832_s25 + $0x190] sm:$0xff] %v323_v44  ;;  %388 = vst [vmem:[%s832_s25 + $0x198] sm:$0xff] %v324_v45 }
  0x64   : > { %389 = vst [vmem:[%s832_s25 + $0x1a0] sm:$0xff] %v325_v46  ;;  %v328_v55 = vadd.f32 %v802_v2, %v262_v47  ;;  %v265_v56 = vmul.f32 %v800_v1, %v199_v41  ;;  %v266_v57 = vmul.f32 %v800_v1, %v200_v42  ;;  %v267_v58 = vmul.f32 %v800_v1, %v201_v43 }
  0x65   : > { %390 = vst [vmem:[%s832_s25 + $0x1a8] sm:$0xff] %v326_v50  ;;  %391 = vst [vmem:[%s832_s25 + $0x1b0] sm:$0xff] %v327_v51  ;;  %v329_v59 = vadd.f32 %v802_v2, %v263_v52  ;;  %v330_v60 = vadd.f32 %v802_v2, %v264_v53  ;;  %v268_v61 = vmul.f32 %v800_v1, %v202_v48 }
  0x66   : > { %v269_v62 = vmul.f32 %v800_v1, %v203_v49  ;;  %392 = vst [vmem:[%s832_s25 + $0x1b8] sm:$0xff] %v328_v55  ;;  %v331_v63 = vadd.f32 %v802_v2, %v265_v56  ;;  %v332_v0 = vadd.f32 %v802_v2, %v266_v57  ;;  %v333_v3 = vadd.f32 %v802_v2, %v267_v58 }
  0x67   : > { %v270_v4 = vmul.f32 %v800_v1, %v204_v54  ;;  %393 = vst [vmem:[%s832_s25 + $0x1c0] sm:$0xff] %v329_v59  ;;  %394 = vst [vmem:[%s832_s25 + $0x1c8] sm:$0xff] %v330_v60  ;;  %v334_v5 = vadd.f32 %v802_v2, %v268_v61 }
  0x68   : > { %v335_v6 = vadd.f32 %v802_v2, %v269_v62  ;;  %395 = vst [vmem:[%s832_s25 + $0x1d0] sm:$0xff] %v331_v63  ;;  %396 = vst [vmem:[%s832_s25 + $0x1d8] sm:$0xff] %v332_v0 }
  0x69   : > { %397 = vst [vmem:[%s832_s25 + $0x1e0] sm:$0xff] %v333_v3  ;;  %v336_v1 = vadd.f32 %v802_v2, %v270_v4  ;;  %398 = vst [vmem:[%s832_s25 + $0x1e8] sm:$0xff] %v334_v5 }
  0x6a   : > { %399 = vst [vmem:[%s832_s25 + $0x1f0] sm:$0xff] %v335_v6 }
  0x6b   : > { %400 = vst [vmem:[%s832_s25 + $0x1f8] sm:$0xff] %v336_v1 }
  0x6c   : > { %597 = shalt.err (!%p594_p1)
}
  0x6d   : > { %s598_s24 = scalar_lea.hbm %s1061_s13, 8192  ;;  %s602_s30 = scalar_lea.hbm %s1116_s3, 24576 }
  0x6e   : > { %p599_p3 = scmp.ne.s32.totalorder %s1061_s13, %s598_s24  ;;  %p603_p0 = scmp.lt.u32.totalorder %s1061_s13, %s1116_s3 }
  0x6f   : > { %p604_p2 = scmp.lt.u32.totalorder %s602_s30, %s598_s24  ;;  %p606_p6 = scmp.lt.u32.totalorder %s598_s24, %s1061_s13 }
  0x70   : > { %p600_p4 = pnand %p599_p3, %p1123_p10 }
  0x71   : > { %p605_p7 = por %p604_p2, %p603_p0 }
  0x72   : > { %p601_p5 = pneg %p600_p4 }
  0x73   : > { %p607_p11 = por %p606_p6, %p605_p7 }
  0x75   : > { %p608_p12 = pnand %p607_p11, %p601_p5 }
  0x77   : > { %611 = shalt.err (!%p608_p12)
}
  0x78   : > { %s656_s11 = smov 128   ;;  %s657_s6 = smov 8  }
  0x79   : > { %506 = dma.vmem_to_hbm [thread:$0]  (%p1123_p10), %s1063_s10, 8192, %s1061_s13, %s402_s14, %s656_s11, %s656_s11, %s657_s6  }
  0x7a PF: > { %p517_p8 = scmp.ge.s32.totalorder %s650_s19, 2  ;;  %s430_s8 = sand.u32 1, %s638_s16  }
  0x7b   : > { %p1124_p9 = scmp.ne.s32.totalorder %s1121_s27, 0  ;;  %s431_s25 = scalar_lea.sflag [#allocation7], %s430_s8 }
  0x7d   : > { %p513_p13 = pnand %p517_p8, %p1124_p9 }
  0x7f   : > { %633 = dma.done.wait (!%p513_p13), %s431_s25, 8192  }
  0x80   : > { %635 = vsyncadd (!%p513_p13), %s431_s25, 4294959104  ;;  %p18_p1 = scmp.ge.s32.totalorder %s709_s20, 5   ;;  %s1125_s16 = smov %s642_s17 }
  0x81   : > { %s1126_s17 = smov %s646_s18  ;;  %s1127_s18 = smov %s721_s23 }
  0x82   : > { %s1128_s19 = smov %s709_s20  ;;  %20 = sbr.rel (!%p18_p1) target bundleno = 8 (0x8), region = 69 }
  0x89   :  { %436 = vsyncpa [#allocation6], 1 }
  0x8a   :  { %438 = vsyncpa [#allocation6 + $0x1], 1 }
  0x8b   :  { %439 = vsyncpa [#allocation7], 1 }
  0x8c   :  { %441 = vsyncpa [#allocation7 + $0x1], 1 }

</bundles_post_ra>
